<compile_context>
chip_gen: v7x
topology: tpu7x:2x2x1
jax: 0.10.0
libtpu: 0.0.40
codegen_flags: <defaults>
</compile_context>

<pallas_src>
import math
import jax
import jax.numpy as jnp
import numpy as np
from jax.experimental import pallas as pl
from jax.experimental.pallas import tpu as pltpu

LANE = 128  # TPU vreg lane width


# ----------------------------- Pallas kernel ---------------------------------

def ann_kernel(x_ref, w1_ref, b1_ref, w2_ref, b2_ref, w3_ref, b3_ref, out_ref):
    # One tile of rows: (tile_rows, nx) -> (tile_rows, ny)
    x = x_ref[...].astype(jnp.bfloat16)

    # i2h + ReLU
    h = jnp.dot(x, w1_ref[...], preferred_element_type=jnp.float32) + b1_ref[...]
    h = jnp.maximum(h, 0.0)

    # h2h
    h2 = (jnp.dot(h.astype(jnp.bfloat16), w2_ref[...],
                  preferred_element_type=jnp.float32) + b2_ref[...])

    # h2o
    yt = (jnp.dot(h2.astype(jnp.bfloat16), w3_ref[...],
                  preferred_element_type=jnp.float32) + b3_ref[...])

    out_ref[...] = yt.astype(out_ref.dtype)


# ------------------------------ wrapper ---------------------------------------

def _round_up(a, b):
    return (a + b - 1) // b * b


def _pad_hidden(p):
    """Zero-pad the hidden dimension to a multiple of 128 (exact, lane-aligned)."""
    H = p["w1"].shape[1]
    Hp = _round_up(H, LANE)
    if Hp == H:
        return p
    d = Hp - H
    return dict(
        w1=jnp.pad(p["w1"], ((0, 0), (0, d))),
        b1=jnp.pad(p["b1"], ((0, 0), (0, d))),
        w2=jnp.pad(p["w2"], ((0, d), (0, d))),
        b2=jnp.pad(p["b2"], ((0, 0), (0, d))),
        w3=jnp.pad(p["w3"], ((0, d), (0, 0))),
        b3=p["b3"],
    )


def ann_forward(x, params, *, tile_rows=256):
    nt, ngrid, nx = x.shape
    ny = params["w3"].shape[1]

    pp = _pad_hidden(params)
    Hp = pp["w1"].shape[1]

    # Flatten the independent (t, grid) axes into rows and pad to a tile multiple.
    R = nt * ngrid
    Rp = _round_up(R, tile_rows)
    xf = x.reshape(R, nx)
    if Rp != R:
        xf = jnp.pad(xf, ((0, Rp - R), (0, 0)))

    full = lambda shape: pl.BlockSpec(shape, lambda i: (0, 0))  # resident weights

    out_flat = pl.pallas_call(
        ann_kernel,
        out_shape=jax.ShapeDtypeStruct((Rp, ny), jnp.float32),
        grid_spec=pltpu.PrefetchScalarGridSpec(
            num_scalar_prefetch=0,
            grid=(Rp // tile_rows,),
            in_specs=[
                pl.BlockSpec((tile_rows, nx), lambda i: (i, 0)),  # x rows
                full((nx, Hp)),   # i2h weight (bf16)
                full((1, Hp)),    # i2h bias  (f32)
                full((Hp, Hp)),   # h2h weight (bf16)
                full((1, Hp)),    # h2h bias  (f32)
                full((Hp, ny)),   # h2o weight (bf16)
                full((1, ny)),    # h2o bias  (f32)
            ],
            out_specs=pl.BlockSpec((tile_rows, ny), lambda i: (i, 0)),
        ),
        compiler_params=pltpu.CompilerParams(
            # Row tiles are independent -> megacore-shardable on v7x.
            dimension_semantics=("parallel",)),
    )(xf, pp["w1"], pp["b1"], pp["w2"], pp["b2"], pp["w3"], pp["b3"])

    return out_flat[:R].reshape(nt, ngrid, ny)


# ------------------------- pure-JAX reference ---------------------------------

def reference_forward(x, p):
    """Literal per-timestep loop like the PyTorch module, with the same
    mixed-precision policy as the kernel (bf16 matmul operands, f32 accum)."""
    nt, ngrid, nx = x.shape
    outs = []
    for t in range(nt):
        xt = x[t].astype(jnp.bfloat16)
        h = jnp.maximum(
            jnp.dot(xt, p["w1"], preferred_element_type=jnp.float32) + p["b1"], 0.0)
        h2 = (jnp.dot(h.astype(jnp.bfloat16), p["w2"],
                      preferred_element_type=jnp.float32) + p["b2"])
        yt = (jnp.dot(h2.astype(jnp.bfloat16), p["w3"],
                      preferred_element_type=jnp.float32) + p["b3"])
        outs.append(yt)
    return jnp.stack(outs, axis=0)


# ------------------------- parameter initialization ---------------------------

def init_params(key, nx, ny, hidden):
    """PyTorch nn.Linear-style init; weights stored (in, out) in bf16, biases f32."""
    ks = jax.random.split(key, 6)

    def lin(kw, kb, fan_in, fan_out):
        bound = 1.0 / math.sqrt(fan_in)
        w = jax.random.uniform(kw, (fan_in, fan_out), jnp.float32, -bound, bound)
        b = jax.random.uniform(kb, (1, fan_out), jnp.float32, -bound, bound)
        return w.astype(jnp.bfloat16), b

    w1, b1 = lin(ks[0], ks[1], nx, hidden)
    w2, b2 = lin(ks[2], ks[3], hidden, hidden)
    w3, b3 = lin(ks[4], ks[5], hidden, ny)
    return dict(w1=w1, b1=b1, w2=w2, b2=b2, w3=w3, b3=b3)


# ------------------------------- main -----------------------------------------

if __name__ == "__main__":
    nt, ngrid, nx, ny, hidden = 8, 8, 4, 1, 32

    key = jax.random.PRNGKey(0)
    kx, kp = jax.random.split(key)

    x = jax.random.normal(kx, (nt, ngrid, nx), jnp.float32)
    params = init_params(kp, nx, ny, hidden)

    out = jax.block_until_ready(ann_forward(x, params))
    ref = jax.block_until_ready(reference_forward(x, params))

    np.testing.assert_allclose(np.asarray(out), np.asarray(ref),
                               rtol=1e-3, atol=1e-3)
    print("KERNEL_OK")
</pallas_src>

<mosaic_0001>
module attributes {stable_mosaic.version = 11 : i64} {
  func.func @ann_kernel(%arg0: i32, %arg1: memref<256x4xf32, #tpu.memory_space<vmem>>, %arg2: memref<4x128xbf16, #tpu.memory_space<vmem>>, %arg3: memref<1x128xf32, #tpu.memory_space<vmem>>, %arg4: memref<128x128xbf16, #tpu.memory_space<vmem>>, %arg5: memref<1x128xf32, #tpu.memory_space<vmem>>, %arg6: memref<128x1xbf16, #tpu.memory_space<vmem>>, %arg7: memref<1x1xf32, #tpu.memory_space<vmem>>, %arg8: memref<256x1xf32, #tpu.memory_space<vmem>>) attributes {dimension_semantics = [#tpu.dimension_semantics<parallel>], iteration_bounds = array<i64: 1>, scalar_prefetch = 0 : i64, scratch_operands = 0 : i64, tpu.core_type = #tpu.core_type<tc>, window_params = [{transform_indices = @transform_0, window_bounds = array<i64: 256, 4>}, {pipeline_mode = #tpu.pipeline_mode<synchronous>, transform_indices = @transform_1, window_bounds = array<i64: 4, 128>}, {pipeline_mode = #tpu.pipeline_mode<synchronous>, transform_indices = @transform_2, window_bounds = array<i64: 1, 128>}, {pipeline_mode = #tpu.pipeline_mode<synchronous>, transform_indices = @transform_3, window_bounds = array<i64: 128, 128>}, {pipeline_mode = #tpu.pipeline_mode<synchronous>, transform_indices = @transform_4, window_bounds = array<i64: 1, 128>}, {pipeline_mode = #tpu.pipeline_mode<synchronous>, transform_indices = @transform_5, window_bounds = array<i64: 128, 1>}, {pipeline_mode = #tpu.pipeline_mode<synchronous>, transform_indices = @transform_6, window_bounds = array<i64: 1, 1>}, {transform_indices = @transform_7, window_bounds = array<i64: 256, 1>}]} {
    %c0 = arith.constant 0 : index
    %c0_0 = arith.constant 0 : index
    %0 = vector.load %arg1[%c0, %c0_0] : memref<256x4xf32, #tpu.memory_space<vmem>>, vector<256x4xf32>
    %1 = arith.truncf %0 : vector<256x4xf32> to vector<256x4xbf16>
    %c0_1 = arith.constant 0 : index
    %c0_2 = arith.constant 0 : index
    %2 = vector.load %arg2[%c0_1, %c0_2] : memref<4x128xbf16, #tpu.memory_space<vmem>>, vector<4x128xbf16>
    %cst = arith.constant dense<0.000000e+00> : vector<256x128xf32>
    %3 = tpu.matmul %1, %2, %cst {dimension_numbers = #tpu.dot_dimension_numbers<[1], [0], [0], [1], [0, 0, 1, 1], [], []>} : vector<256x4xbf16>, vector<4x128xbf16>, vector<256x128xf32> -> vector<256x128xf32>
    %c0_3 = arith.constant 0 : index
    %c0_4 = arith.constant 0 : index
    %4 = vector.load %arg3[%c0_3, %c0_4] : memref<1x128xf32, #tpu.memory_space<vmem>>, vector<1x128xf32>
    %5 = vector.broadcast %4 : vector<1x128xf32> to vector<256x128xf32>
    %6 = arith.addf %3, %5 : vector<256x128xf32>
    %cst_5 = arith.constant 0.000000e+00 : f32
    %7 = vector.broadcast %cst_5 : f32 to vector<256x128xf32>
    %8 = arith.maximumf %6, %7 : vector<256x128xf32>
    %9 = arith.truncf %8 : vector<256x128xf32> to vector<256x128xbf16>
    %c0_6 = arith.constant 0 : index
    %c0_7 = arith.constant 0 : index
    %10 = vector.load %arg4[%c0_6, %c0_7] : memref<128x128xbf16, #tpu.memory_space<vmem>>, vector<128x128xbf16>
    %cst_8 = arith.constant dense<0.000000e+00> : vector<256x128xf32>
    %11 = tpu.matmul %9, %10, %cst_8 {dimension_numbers = #tpu.dot_dimension_numbers<[1], [0], [0], [1], [0, 0, 1, 1], [], []>} : vector<256x128xbf16>, vector<128x128xbf16>, vector<256x128xf32> -> vector<256x128xf32>
    %c0_9 = arith.constant 0 : index
    %c0_10 = arith.constant 0 : index
    %12 = vector.load %arg5[%c0_9, %c0_10] : memref<1x128xf32, #tpu.memory_space<vmem>>, vector<1x128xf32>
    %13 = vector.broadcast %12 : vector<1x128xf32> to vector<256x128xf32>
    %14 = arith.addf %11, %13 : vector<256x128xf32>
    %15 = arith.truncf %14 : vector<256x128xf32> to vector<256x128xbf16>
    %c0_11 = arith.constant 0 : index
    %c0_12 = arith.constant 0 : index
    %16 = vector.load %arg6[%c0_11, %c0_12] : memref<128x1xbf16, #tpu.memory_space<vmem>>, vector<128x1xbf16>
    %cst_13 = arith.constant dense<0.000000e+00> : vector<256x1xf32>
    %17 = tpu.matmul %15, %16, %cst_13 {dimension_numbers = #tpu.dot_dimension_numbers<[1], [0], [0], [1], [0, 0, 1, 1], [], []>} : vector<256x128xbf16>, vector<128x1xbf16>, vector<256x1xf32> -> vector<256x1xf32>
    %c0_14 = arith.constant 0 : index
    %c0_15 = arith.constant 0 : index
    %18 = vector.load %arg7[%c0_14, %c0_15] : memref<1x1xf32, #tpu.memory_space<vmem>>, vector<1x1xf32>
    %19 = vector.broadcast %18 : vector<1x1xf32> to vector<256x1xf32>
    %20 = arith.addf %17, %19 : vector<256x1xf32>
    %c0_16 = arith.constant 0 : index
    %c0_17 = arith.constant 0 : index
    %21 = vector.load %arg8[%c0_16, %c0_17] : memref<256x1xf32, #tpu.memory_space<vmem>>, vector<256x1xf32>
    tpu.vector_store %arg8[%c0_16, %c0_17], %20 {strides = array<i32>} : memref<256x1xf32, #tpu.memory_space<vmem>>, vector<256x1xf32>,
    return
  }
  func.func @transform_0(%arg0: i32) -> (i32, i32) {
    %c0_i32 = arith.constant 0 : i32
    %c0_i32_0 = arith.constant 0 : i32
    return %arg0, %c0_i32 : i32, i32
  }
  func.func @transform_1(%arg0: i32) -> (i32, i32) {
    %c0_i32 = arith.constant 0 : i32
    %c0_i32_0 = arith.constant 0 : i32
    %c0_i32_1 = arith.constant 0 : i32
    return %c0_i32, %c0_i32_0 : i32, i32
  }
  func.func @transform_2(%arg0: i32) -> (i32, i32) {
    %c0_i32 = arith.constant 0 : i32
    %c0_i32_0 = arith.constant 0 : i32
    %c0_i32_1 = arith.constant 0 : i32
    return %c0_i32, %c0_i32_0 : i32, i32
  }
  func.func @transform_3(%arg0: i32) -> (i32, i32) {
    %c0_i32 = arith.constant 0 : i32
    %c0_i32_0 = arith.constant 0 : i32
    %c0_i32_1 = arith.constant 0 : i32
    return %c0_i32, %c0_i32_0 : i32, i32
  }
  func.func @transform_4(%arg0: i32) -> (i32, i32) {
    %c0_i32 = arith.constant 0 : i32
    %c0_i32_0 = arith.constant 0 : i32
    %c0_i32_1 = arith.constant 0 : i32
    return %c0_i32, %c0_i32_0 : i32, i32
  }
  func.func @transform_5(%arg0: i32) -> (i32, i32) {
    %c0_i32 = arith.constant 0 : i32
    %c0_i32_0 = arith.constant 0 : i32
    %c0_i32_1 = arith.constant 0 : i32
    return %c0_i32, %c0_i32_0 : i32, i32
  }
  func.func @transform_6(%arg0: i32) -> (i32, i32) {
    %c0_i32 = arith.constant 0 : i32
    %c0_i32_0 = arith.constant 0 : i32
    %c0_i32_1 = arith.constant 0 : i32
    return %c0_i32, %c0_i32_0 : i32, i32
  }
  func.func @transform_7(%arg0: i32) -> (i32, i32) {
    %c0_i32 = arith.constant 0 : i32
    %c0_i32_0 = arith.constant 0 : i32
    return %arg0, %c0_i32 : i32, i32
  }
}

</mosaic_0001>

<bundles_post_ra>
// kernel: tpu_custom_call.1
= control target key start
LH: loop header
LB: loop body
LE: loop exit
PB: predicated region body
PF: predicated region fallthrough
CT: control target
= control target key end

     0   :  { %vm134_vm0 = vcmask 1041408   ;;  %vm85_vm1 = vcmask 31744   ;;  %vm827_vm2 = vcmask 7168   ;;  %s1562_s1 = inlined_call_operand.vmem [shape: bf16[4,128], index: 1, kind: input, shape index: {}]   ;;  %s1563_s0 = inlined_call_operand.vmem [shape: f32[256,4], index: 0, kind: input, shape index: {}]   ;;  %s1564_s3 = inlined_call_operand.vmem [shape: bf16[128,128], index: 3, kind: input, shape index: {}]   ;;  %s1565_s5 = inlined_call_operand.vmem [shape: bf16[128,1], index: 5, kind: input, shape index: {}]   ;;  %s1566_s2 = inlined_call_operand.vmem [shape: f32[1,128], index: 2, kind: input, shape index: {}]   ;;  %s1567_s6 = inlined_call_operand.<no memory space> [shape: f32[1,1], index: 6, kind: input, shape index: {}]   ;;  %s1568_s4 = inlined_call_operand.vmem [shape: f32[1,128], index: 4, kind: input, shape index: {}]   ;;  %s1569_s7 = inlined_call_operand.vmem [shape: f32[256,1], index: 7, kind: output, shape index: {}]  }
   0x1   :  { %v77_v0 = vld [vmem:[%s1562_s1] sm:$0x3]  ;;  %v30_v2 = vld [vmem:[%s1563_s0 + $0x8] sm:$0xff]  ;;  %v31_v5 = vld [vmem:[%s1563_s0 + $0x10] sm:$0xff] }
   0x2   :  { %v29_v1 = vld [vmem:[%s1563_s0] sm:$0xff]  ;;  %1096 = vmatprep.subr.msk.bf16.mxu0 %vm134_vm0, %v77_v0  ;;  %v136_v3 = vsel %vm134_vm0, %v77_v0, 0  ;;  %v32_v6 = vld [vmem:[%s1563_s0 + $0x18] sm:$0xff]  ;;  %1097 = vmatprep.subr.msk.bf16.mxu1 %vm134_vm0, %v77_v0  ;;  %v34_v9 = vld [vmem:[%s1563_s0 + $0x28] sm:$0xff] }
   0x3   :  { %v61_v4 = vpack.c.bf16 %v30_v2, %v29_v1  ;;  %v33_v7 = vld [vmem:[%s1563_s0 + $0x20] sm:$0xff]  ;;  %965 = vmatpush3.bf16.msra.mxu0 %v136_v3  ;;  %v62_v8 = vpack.c.bf16 %v32_v6, %v31_v5  ;;  %1095 = vmatpush3.bf16.msra.mxu1 %v136_v3  ;;  %v35_v11 = vld [vmem:[%s1563_s0 + $0x30] sm:$0xff]  ;;  %v36_v12 = vld [vmem:[%s1563_s0 + $0x38] sm:$0xff] }
   0x4   :  { %v63_v10 = vpack.c.bf16 %v34_v9, %v33_v7  ;;  %v37_v13 = vld [vmem:[%s1563_s0 + $0x40] sm:$0xff]  ;;  %v46_v15 = vld [vmem:[%s1563_s0 + $0x88] sm:$0xff]  ;;  %v47_v16 = vld [vmem:[%s1563_s0 + $0x90] sm:$0xff]  ;;  %v64_v24 = vpack.c.bf16 %v36_v12, %v35_v11 }
   0x5   :  { %966 = vmatprep.mubr.msk.bf16.mxu0 %vm85_vm1, %v61_v4  ;;  %v45_v14 = vld [vmem:[%s1563_s0 + $0x80] sm:$0xff]  ;;  %v48_v17 = vld [vmem:[%s1563_s0 + $0x98] sm:$0xff]  ;;  %v38_v18 = vld [vmem:[%s1563_s0 + $0x48] sm:$0xff] }
   0x6   :  { %967 = vmatmul.mubr.msk.bf16.vlgmr.msra.gmra.mrb[0].mxu0 %vm85_vm1, %v62_v8  ;;  %v69_v19 = vpack.c.bf16 %v46_v15, %v45_v14  ;;  %v70_v20 = vpack.c.bf16 %v48_v17, %v47_v16  ;;  %v49_v21 = vld [vmem:[%s1563_s0 + $0xa0] sm:$0xff]  ;;  %v50_v22 = vld [vmem:[%s1563_s0 + $0xa8] sm:$0xff]  ;;  %v51_v25 = vld [vmem:[%s1563_s0 + $0xb0] sm:$0xff]  ;;  %v65_v26 = vpack.c.bf16 %v38_v18, %v37_v13 }
   0x7   :  { %970 = vmatprep.mubr.msk.bf16.mxu0 %vm85_vm1, %v63_v10  ;;  %v71_v23 = vpack.c.bf16 %v50_v22, %v49_v21  ;;  %v52_v27 = vld [vmem:[%s1563_s0 + $0xb8] sm:$0xff]  ;;  %v53_v28 = vld [vmem:[%s1563_s0 + $0xc0] sm:$0xff]  ;;  %v54_v29 = vld [vmem:[%s1563_s0 + $0xc8] sm:$0xff] }
   0x8   :  { %982 = vmatprep.mubr.msk.bf16.mxu1 %vm85_vm1, %v69_v19  ;;  %v1098_v30 = vld [vmem:[%s1564_s3] sm:$0xff]   ;;  %v39_v31 = vld [vmem:[%s1563_s0 + $0x50] sm:$0xff]  ;;  %v1099_v32 = vld [vmem:[%s1564_s3 + $0x8] sm:$0xff]   ;;  %v72_v35 = vpack.c.bf16 %v52_v27, %v51_v25  ;;  %v73_v37 = vpack.c.bf16 %v54_v29, %v53_v28 }
   0x9   :  { %983 = vmatmul.mubr.msk.bf16.vlgmr.msra.gmra.mrb[0].mxu1 %vm85_vm1, %v70_v20  ;;  %v40_v33 = vld [vmem:[%s1563_s0 + $0x58] sm:$0xff]  ;;  %998 = vmatprep.subr.bf16.mxu1 %v1098_v30  ;;  %v41_v34 = vld [vmem:[%s1563_s0 + $0x60] sm:$0xff]  ;;  %v42_v36 = vld [vmem:[%s1563_s0 + $0x68] sm:$0xff] }
   0xa   :  { %986 = vmatprep.mubr.msk.bf16.mxu1 %vm85_vm1, %v71_v23  ;;  %999 = vmatpush3.bf16.msra.mxu1 %v1098_v30  ;;  %v1100_v38 = vld [vmem:[%s1564_s3 + $0x10] sm:$0xff]   ;;  %v66_v39 = vpack.c.bf16 %v40_v33, %v39_v31  ;;  %v67_v40 = vpack.c.bf16 %v42_v36, %v41_v34  ;;  %v56_v42 = vld [vmem:[%s1563_s0 + $0xd8] sm:$0xff]  ;;  %v57_v43 = vld [vmem:[%s1563_s0 + $0xe0] sm:$0xff] }
   0xb   :  { %1000 = vmatprep.subr.bf16.mxu1 %v1099_v32  ;;  %v55_v41 = vld [vmem:[%s1563_s0 + $0xd0] sm:$0xff]  ;;  %v58_v44 = vld [vmem:[%s1563_s0 + $0xe8] sm:$0xff]  ;;  %v1101_v45 = vld [vmem:[%s1564_s3 + $0x18] sm:$0xff]  }
   0xc   :  { %v43_v46 = vld [vmem:[%s1563_s0 + $0x70] sm:$0xff]  ;;  %v44_v47 = vld [vmem:[%s1563_s0 + $0x78] sm:$0xff]  ;;  %v74_v48 = vpack.c.bf16 %v56_v42, %v55_v41  ;;  %v75_v49 = vpack.c.bf16 %v58_v44, %v57_v43  ;;  %v1102_v50 = vld [vmem:[%s1564_s3 + $0x20] sm:$0xff]  }
   0xd   :  { %v68_v51 = vpack.c.bf16 %v44_v47, %v43_v46  ;;  %v59_v52 = vld [vmem:[%s1563_s0 + $0xf0] sm:$0xff]  ;;  %v60_v53 = vld [vmem:[%s1563_s0 + $0xf8] sm:$0xff]  ;;  %v1103_v54 = vld [vmem:[%s1564_s3 + $0x28] sm:$0xff]  }
   0xe   :  { %971 = vmatmul.mubr.msk.bf16.gmra.mrb[4].mxu0 %vm85_vm1, %v64_v24  ;;  %1001 = vmatpush3.bf16.msra.mxu1 %v1099_v32  ;;  %v76_v55 = vpack.c.bf16 %v60_v53, %v59_v52  ;;  %v1104_v56 = vld [vmem:[%s1564_s3 + $0x30] sm:$0xff]   ;;  %v1105_v57 = vld [vmem:[%s1564_s3 + $0x38] sm:$0xff]   ;;  %v1106_v58 = vld [vmem:[%s1565_s5] sm:$0xff]  }
   0xf   :  { %974 = vmatprep.mubr.msk.bf16.mxu0 %vm85_vm1, %v65_v26  ;;  %1002 = vmatprep.subr.bf16.mxu1 %v1100_v38  ;;  %v1107_v59 = vld [vmem:[%s1565_s5 + $0x8] sm:$0xff]   ;;  %v1108_v60 = vld [vmem:[%s1565_s5 + $0x10] sm:$0xff]   ;;  %v1109_v61 = vld [vmem:[%s1565_s5 + $0x18] sm:$0xff]  }
  0x10   :  { %1046 = vmatprep.subr.bf16.mxu0 %v1106_v58  ;;  %v1110_v62 = vld [vmem:[%s1565_s5 + $0x20] sm:$0xff]   ;;  %v1111_v63 = vld [vmem:[%s1565_s5 + $0x28] sm:$0xff]  }
  0x11   :  { %987 = vmatmul.mubr.msk.bf16.gmra.mrb[4].mxu1 %vm85_vm1, %v72_v35  ;;  %1047 = vmatpush3.bf16.msra.mxu0 %v1106_v58  ;;  %v1314_v0 = vld [vmem:[%s1566_s2] ss:$0 sm:$0xff] }
  0x12   :  { %990 = vmatprep.mubr.msk.bf16.mxu1 %vm85_vm1, %v73_v37  ;;  %1003 = vmatpush3.bf16.msra.mxu1 %v1100_v38 }
  0x13   :  { %1004 = vmatprep.subr.bf16.mxu1 %v1101_v45  ;;  %1048 = vmatprep.subr.bf16.mxu0 %v1107_v59 }
  0x15   :  { %1049 = vmatpush3.bf16.msra.mxu0 %v1107_v59 }
  0x16   :  { %975 = vmatmul.mubr.msk.bf16.gmra.mrb[8].mxu0 %vm85_vm1, %v66_v39  ;;  %1005 = vmatpush3.bf16.msra.mxu1 %v1101_v45 }
  0x17   :  { %978 = vmatprep.mubr.msk.bf16.mxu0 %vm85_vm1, %v67_v40  ;;  %1006 = vmatprep.subr.bf16.mxu1 %v1102_v50 }
  0x18   :  { %1050 = vmatprep.subr.bf16.mxu0 %v1108_v60 }
  0x19   :  { %991 = vmatmul.mubr.msk.bf16.gmra.mrb[8].mxu1 %vm85_vm1, %v74_v48  ;;  %1051 = vmatpush3.bf16.msra.mxu0 %v1108_v60 }
  0x1a   :  { %994 = vmatprep.mubr.msk.bf16.mxu1 %vm85_vm1, %v75_v49  ;;  %1007 = vmatpush3.bf16.msra.mxu1 %v1102_v50 }
  0x1b   :  { %1008 = vmatprep.subr.bf16.mxu1 %v1103_v54  ;;  %1052 = vmatprep.subr.bf16.mxu0 %v1109_v61 }
  0x1d   :  { %1053 = vmatpush3.bf16.msra.mxu0 %v1109_v61 }
  0x1e   :  { %979 = vmatmul.mubr.msk.bf16.gmra.mrb[12].mxu0 %vm85_vm1, %v68_v51  ;;  %1009 = vmatpush3.bf16.msra.mxu1 %v1103_v54 }
  0x1f   :  { %1010 = vmatprep.subr.bf16.mxu1 %v1104_v56  ;;  %1054 = vmatprep.subr.bf16.mxu0 %v1110_v62 }
  0x21   :  { %995 = vmatmul.mubr.msk.bf16.gmra.mrb[12].mxu1 %vm85_vm1, %v76_v55  ;;  %1055 = vmatpush3.bf16.msra.mxu0 %v1110_v62 }
  0x22   :  { %1011 = vmatpush3.bf16.msra.mxu1 %v1104_v56  ;;  %1056 = vmatprep.subr.bf16.mxu0 %v1111_v63 }
  0x23   :  { %1012 = vmatprep.subr.bf16.mxu1 %v1105_v57 }
  0x25   :  { %1057 = vmatpush3.bf16.msra.mxu0 %v1111_v63 }
  0x26   :  { %1013 = vmatpush3.bf16.msra.mxu1 %v1105_v57 }
  0xd9   :  { %v968_v1 = vpop.f32.mrb[0].mxu0 }
  0xda   :  { %v181_v2 = vadd.f32 %v968_v1, %v1314_v0  ;;  %v172_v3 = vpop.f32.mrb[1].mxu0 }
  0xdb   :  { %v173_v4 = vadd.f32 %v1314_v0, %v172_v3  ;;  %v969_v5 = vpop.f32.mrb[2].mxu0 }
  0xdc   :  { %v184_v6 = vadd.f32 %v969_v5, %v1314_v0  ;;  %v175_v7 = vpop.f32.mrb[3].mxu0  ;;  %v301_v9 = vmax.f32 %v181_v2, 0.0  ;;  %v984_v11 = vpop.f32.mrb[0].mxu1 }
  0xdd   :  { %v176_v8 = vadd.f32 %v1314_v0, %v175_v7  ;;  %v299_v12 = vmax.f32 %v173_v4, 0.0  ;;  %v245_v14 = vadd.f32 %v984_v11, %v1314_v0  ;;  %v236_v15 = vpop.f32.mrb[1].mxu1 }
  0xde   :  { %v302_v10 = vmax.f32 %v184_v6, 0.0  ;;  %v237_v17 = vadd.f32 %v1314_v0, %v236_v15  ;;  %v985_v18 = vpop.f32.mrb[2].mxu1 }
  0xdf   :  { %v300_v13 = vmax.f32 %v176_v8, 0.0  ;;  %v317_v21 = vmax.f32 %v245_v14, 0.0  ;;  %v248_v22 = vadd.f32 %v985_v18, %v1314_v0  ;;  %v239_v23 = vpop.f32.mrb[3].mxu1 }
  0xe0   :  { %v332_v16 = vpack.c.bf16 %v302_v10, %v301_v9  ;;  %v315_v26 = vmax.f32 %v237_v17, 0.0  ;;  %v240_v27 = vadd.f32 %v1314_v0, %v239_v23 }
  0xe1   :  { %v331_v19 = vpack.c.bf16 %v300_v13, %v299_v12  ;;  %v972_v20 = vpop.f32.mrb[4].mxu0  ;;  %v318_v30 = vmax.f32 %v248_v22, 0.0 }
  0xe2   :  { %v197_v24 = vadd.f32 %v972_v20, %v1314_v0  ;;  %v188_v25 = vpop.f32.mrb[5].mxu0  ;;  %v316_v33 = vmax.f32 %v240_v27, 0.0 }
  0xe3   :  { %v189_v28 = vadd.f32 %v1314_v0, %v188_v25  ;;  %v973_v29 = vpop.f32.mrb[6].mxu0  ;;  %1014 = vmatprep.mubr.bf16.mxu1 %v331_v19  ;;  %v1328_v35 = vpack.c.bf16 %v318_v30, %v317_v21 }
  0xe4   :  { %v200_v31 = vadd.f32 %v973_v29, %v1314_v0  ;;  %v191_v32 = vpop.f32.mrb[7].mxu0  ;;  %1015 = vmatmul.mubr.bf16.vlgmr.msra.gmra.mrb[16].mxu1 %v332_v16  ;;  %v305_v36 = vmax.f32 %v197_v24, 0.0  ;;  %v1330_v38 = vpack.c.bf16 %v316_v33, %v315_v26  ;;  %v988_v39 = vpop.f32.mrb[4].mxu1 }
  0xe5   :  { %v192_v34 = vadd.f32 %v1314_v0, %v191_v32  ;;  %v303_v40 = vmax.f32 %v189_v28, 0.0  ;;  %v261_v42 = vadd.f32 %v988_v39, %v1314_v0  ;;  %v252_v43 = vpop.f32.mrb[5].mxu1 }
  0xe6   :  { %v306_v37 = vmax.f32 %v200_v31, 0.0  ;;  %v253_v45 = vadd.f32 %v1314_v0, %v252_v43  ;;  %v989_v46 = vpop.f32.mrb[6].mxu1 }
  0xe7   :  { %v304_v41 = vmax.f32 %v192_v34, 0.0  ;;  %v321_v49 = vmax.f32 %v261_v42, 0.0  ;;  %v264_v50 = vadd.f32 %v989_v46, %v1314_v0  ;;  %v255_v51 = vpop.f32.mrb[7].mxu1 }
  0xe8   :  { %v334_v44 = vpack.c.bf16 %v306_v37, %v305_v36  ;;  %v319_v54 = vmax.f32 %v253_v45, 0.0  ;;  %v256_v55 = vadd.f32 %v1314_v0, %v255_v51 }
  0xe9   :  { %v333_v47 = vpack.c.bf16 %v304_v41, %v303_v40  ;;  %v976_v48 = vpop.f32.mrb[8].mxu0  ;;  %v322_v58 = vmax.f32 %v264_v50, 0.0 }
  0xea   :  { %v213_v52 = vadd.f32 %v976_v48, %v1314_v0  ;;  %v204_v53 = vpop.f32.mrb[9].mxu0  ;;  %v320_v61 = vmax.f32 %v256_v55, 0.0 }
  0xeb   :  { %v205_v56 = vadd.f32 %v1314_v0, %v204_v53  ;;  %v977_v57 = vpop.f32.mrb[10].mxu0  ;;  %1018 = vmatprep.mubr.bf16.mxu1 %v333_v47  ;;  %v342_v63 = vpack.c.bf16 %v322_v58, %v321_v49  ;;  %v1366_v53 = vld [vmem:[%s1568_s4] ss:$0 sm:$0xff] }
  0xec   :  { %v216_v59 = vadd.f32 %v977_v57, %v1314_v0  ;;  %v207_v60 = vpop.f32.mrb[11].mxu0  ;;  %1019 = vmatmul.mubr.bf16.gmra.mrb[20].mxu1 %v334_v44  ;;  %v309_v1 = vmax.f32 %v213_v52, 0.0  ;;  %v341_v3 = vpack.c.bf16 %v320_v61, %v319_v54  ;;  %v992_v4 = vpop.f32.mrb[8].mxu1 }
  0xed   :  { %v208_v62 = vadd.f32 %v1314_v0, %v207_v60  ;;  %v307_v5 = vmax.f32 %v205_v56, 0.0  ;;  %v277_v7 = vadd.f32 %v992_v4, %v1314_v0  ;;  %v268_v8 = vpop.f32.mrb[9].mxu1 }
  0xee   :  { %v310_v2 = vmax.f32 %v216_v59, 0.0  ;;  %v269_v10 = vadd.f32 %v1314_v0, %v268_v8  ;;  %v993_v11 = vpop.f32.mrb[10].mxu1 }
  0xef   :  { %v308_v6 = vmax.f32 %v208_v62, 0.0  ;;  %v325_v14 = vmax.f32 %v277_v7, 0.0  ;;  %v280_v15 = vadd.f32 %v993_v11, %v1314_v0  ;;  %v271_v16 = vpop.f32.mrb[11].mxu1 }
  0xf0   :  { %v336_v9 = vpack.c.bf16 %v310_v2, %v309_v1  ;;  %v323_v19 = vmax.f32 %v269_v10, 0.0  ;;  %v272_v20 = vadd.f32 %v1314_v0, %v271_v16 }
  0xf1   :  { %v335_v12 = vpack.c.bf16 %v308_v6, %v307_v5  ;;  %v980_v13 = vpop.f32.mrb[12].mxu0  ;;  %v326_v23 = vmax.f32 %v280_v15, 0.0 }
  0xf2   :  { %v229_v17 = vadd.f32 %v980_v13, %v1314_v0  ;;  %v220_v18 = vpop.f32.mrb[13].mxu0  ;;  %v324_v26 = vmax.f32 %v272_v20, 0.0 }
  0xf3   :  { %v221_v21 = vadd.f32 %v1314_v0, %v220_v18  ;;  %v981_v22 = vpop.f32.mrb[14].mxu0  ;;  %1022 = vmatprep.mubr.bf16.mxu1 %v335_v12  ;;  %v344_v28 = vpack.c.bf16 %v326_v23, %v325_v14 }
  0xf4   :  { %v232_v24 = vadd.f32 %v981_v22, %v1314_v0  ;;  %v223_v25 = vpop.f32.mrb[15].mxu0  ;;  %1023 = vmatmul.mubr.bf16.gmra.mrb[24].mxu1 %v336_v9  ;;  %v313_v29 = vmax.f32 %v229_v17, 0.0  ;;  %v343_v31 = vpack.c.bf16 %v324_v26, %v323_v19  ;;  %v996_v32 = vpop.f32.mrb[12].mxu1 }
  0xf5   :  { %v224_v27 = vadd.f32 %v1314_v0, %v223_v25  ;;  %v311_v33 = vmax.f32 %v221_v21, 0.0  ;;  %v293_v36 = vadd.f32 %v996_v32, %v1314_v0  ;;  %v284_v37 = vpop.f32.mrb[13].mxu1 }
  0xf6   :  { %v314_v30 = vmax.f32 %v232_v24, 0.0  ;;  %v285_v40 = vadd.f32 %v1314_v0, %v284_v37  ;;  %v997_v41 = vpop.f32.mrb[14].mxu1 }
  0xf7   :  { %v312_v34 = vmax.f32 %v224_v27, 0.0  ;;  %v329_v43 = vmax.f32 %v293_v36, 0.0  ;;  %v296_v44 = vadd.f32 %v997_v41, %v1314_v0  ;;  %v287_v45 = vpop.f32.mrb[15].mxu1 }
  0xf8   :  { %v338_v39 = vpack.c.bf16 %v314_v30, %v313_v29  ;;  %v327_v46 = vmax.f32 %v285_v40, 0.0  ;;  %v288_v47 = vadd.f32 %v1314_v0, %v287_v45  ;;  %v1112_v0 = vld [vmem:[%s1565_s5 + $0x30] sm:$0xff]  }
  0xf9   :  { %v337_v42 = vpack.c.bf16 %v312_v34, %v311_v33  ;;  %v330_v48 = vmax.f32 %v296_v44, 0.0  ;;  %1058 = vmatprep.subr.bf16.mxu0 %v1112_v0 }
  0xfa   :  { %v328_v49 = vmax.f32 %v288_v47, 0.0  ;;  %1059 = vmatpush3.bf16.msra.mxu0 %v1112_v0 }
  0xfb   :  { %1026 = vmatprep.mubr.bf16.mxu1 %v337_v42  ;;  %v346_v50 = vpack.c.bf16 %v330_v48, %v329_v43 }
  0xfc   :  { %1027 = vmatmul.mubr.bf16.gmra.mrb[28].mxu1 %v338_v39  ;;  %v345_v51 = vpack.c.bf16 %v328_v49, %v327_v46 }
  0xfd   :  { %1030 = vmatprep.mubr.bf16.mxu1 %v1330_v38  ;;  %v1113_v38 = vld [vmem:[%s1565_s5 + $0x38] sm:$0xff]  }
  0xfe   :  { %1060 = vmatprep.subr.bf16.mxu0 %v1113_v38 }
  0xff   :  { %1061 = vmatpush3.bf16.msra.mxu0 %v1113_v38 }
 0x104   :  { %1031 = vmatmul.mubr.bf16.gmra.mrb[32].mxu1 %v1328_v35  ;;  %v12_v35 = vstv %s1567_s6 }
 0x105   :  { %1034 = vmatprep.mubr.bf16.mxu1 %v341_v3  ;;  %13 = vst [vmem:[#allocation2] sm:$0x1] %v12_v35 }
 0x10c   :  { %1035 = vmatmul.mubr.bf16.gmra.mrb[36].mxu1 %v342_v63 }
 0x10d   :  { %1038 = vmatprep.mubr.bf16.mxu1 %v343_v31 }
 0x114   :  { %1039 = vmatmul.mubr.bf16.gmra.mrb[40].mxu1 %v344_v28 }
 0x115   :  { %1042 = vmatprep.mubr.bf16.mxu1 %v345_v51 }
 0x11c   :  { %1043 = vmatmul.mubr.bf16.gmra.mrb[44].mxu1 %v346_v50 }
 0x1b7   :  { %v1016_v52 = vpop.f32.mrb[16].mxu1 }
 0x1b8   :  { %v452_v54 = vpop.f32.mrb[17].mxu1  ;;  %v461_v56 = vadd.f32 %v1016_v52, %v1366_v53 }
 0x1b9   :  { %v1017_v55 = vpop.f32.mrb[18].mxu1  ;;  %v453_v59 = vadd.f32 %v1366_v53, %v452_v54 }
 0x1ba   :  { %v464_v57 = vadd.f32 %v1017_v55, %v1366_v53  ;;  %v455_v58 = vpop.f32.mrb[19].mxu1 }
 0x1bb   :  { %v456_v60 = vadd.f32 %v1366_v53, %v455_v58 }
 0x1bc   :  { %v580_v61 = vpack.c.bf16 %v464_v57, %v461_v56 }
 0x1bd   :  { %v579_v62 = vpack.c.bf16 %v456_v60, %v453_v59 }
 0x1bf   :  { %v1020_v63 = vpop.f32.mrb[20].mxu1  ;;  %1062 = vmatprep.mubr.bf16.mxu0 %v579_v62 }
 0x1c0   :  { %v468_v1 = vpop.f32.mrb[21].mxu1  ;;  %1063 = vmatmul.mubr.bf16.vlgmr.msra.gmra.mrb[16].mxu0 %v580_v61  ;;  %v477_v3 = vadd.f32 %v1020_v63, %v1366_v53 }
 0x1c1   :  { %v1021_v2 = vpop.f32.mrb[22].mxu1  ;;  %v469_v6 = vadd.f32 %v1366_v53, %v468_v1 }
 0x1c2   :  { %v480_v4 = vadd.f32 %v1021_v2, %v1366_v53  ;;  %v471_v5 = vpop.f32.mrb[23].mxu1 }
 0x1c3   :  { %v472_v7 = vadd.f32 %v1366_v53, %v471_v5 }
 0x1c4   :  { %v582_v8 = vpack.c.bf16 %v480_v4, %v477_v3 }
 0x1c5   :  { %v581_v9 = vpack.c.bf16 %v472_v7, %v469_v6  ;;  %v1400_v7 = vld [vmem:[#allocation2] ss:$0 sm:$0xff] }
 0x1c7   :  { %v1024_v10 = vpop.f32.mrb[24].mxu1  ;;  %1066 = vmatprep.mubr.bf16.mxu0 %v581_v9 }
 0x1c8   :  { %v484_v11 = vpop.f32.mrb[25].mxu1  ;;  %1067 = vmatmul.mubr.bf16.gmra.mrb[20].mxu0 %v582_v8  ;;  %v493_v13 = vadd.f32 %v1024_v10, %v1366_v53 }
 0x1c9   :  { %v1025_v12 = vpop.f32.mrb[26].mxu1  ;;  %v485_v16 = vadd.f32 %v1366_v53, %v484_v11 }
 0x1ca   :  { %v496_v14 = vadd.f32 %v1025_v12, %v1366_v53  ;;  %v487_v15 = vpop.f32.mrb[27].mxu1 }
 0x1cb   :  { %v488_v17 = vadd.f32 %v1366_v53, %v487_v15 }
 0x1cc   :  { %v584_v18 = vpack.c.bf16 %v496_v14, %v493_v13 }
 0x1cd   :  { %v583_v19 = vpack.c.bf16 %v488_v17, %v485_v16 }
 0x1cf   :  { %v1028_v20 = vpop.f32.mrb[28].mxu1  ;;  %1070 = vmatprep.mubr.bf16.mxu0 %v583_v19 }
 0x1d0   :  { %v500_v21 = vpop.f32.mrb[29].mxu1  ;;  %1071 = vmatmul.mubr.bf16.gmra.mrb[24].mxu0 %v584_v18  ;;  %v509_v23 = vadd.f32 %v1028_v20, %v1366_v53 }
 0x1d1   :  { %v1029_v22 = vpop.f32.mrb[30].mxu1  ;;  %v501_v26 = vadd.f32 %v1366_v53, %v500_v21 }
 0x1d2   :  { %v512_v24 = vadd.f32 %v1029_v22, %v1366_v53  ;;  %v503_v25 = vpop.f32.mrb[31].mxu1 }
 0x1d3   :  { %v504_v27 = vadd.f32 %v1366_v53, %v503_v25 }
 0x1d4   :  { %v586_v28 = vpack.c.bf16 %v512_v24, %v509_v23 }
 0x1d5   :  { %v585_v29 = vpack.c.bf16 %v504_v27, %v501_v26 }
 0x1d7   :  { %v1032_v30 = vpop.f32.mrb[32].mxu1  ;;  %1074 = vmatprep.mubr.bf16.mxu0 %v585_v29 }
 0x1d8   :  { %v516_v31 = vpop.f32.mrb[33].mxu1  ;;  %1075 = vmatmul.mubr.bf16.gmra.mrb[28].mxu0 %v586_v28  ;;  %v525_v33 = vadd.f32 %v1032_v30, %v1366_v53 }
 0x1d9   :  { %v1033_v32 = vpop.f32.mrb[34].mxu1  ;;  %v517_v37 = vadd.f32 %v1366_v53, %v516_v31 }
 0x1da   :  { %v528_v34 = vadd.f32 %v1033_v32, %v1366_v53  ;;  %v519_v36 = vpop.f32.mrb[35].mxu1 }
 0x1db   :  { %v520_v39 = vadd.f32 %v1366_v53, %v519_v36 }
 0x1dc   :  { %v588_v40 = vpack.c.bf16 %v528_v34, %v525_v33 }
 0x1dd   :  { %v587_v41 = vpack.c.bf16 %v520_v39, %v517_v37 }
 0x1df   :  { %v1036_v42 = vpop.f32.mrb[36].mxu1  ;;  %1078 = vmatprep.mubr.bf16.mxu0 %v587_v41 }
 0x1e0   :  { %v532_v43 = vpop.f32.mrb[37].mxu1  ;;  %1079 = vmatmul.mubr.bf16.gmra.mrb[32].mxu0 %v588_v40  ;;  %v541_v45 = vadd.f32 %v1036_v42, %v1366_v53 }
 0x1e1   :  { %v1037_v44 = vpop.f32.mrb[38].mxu1  ;;  %v533_v48 = vadd.f32 %v1366_v53, %v532_v43 }
 0x1e2   :  { %v544_v46 = vadd.f32 %v1037_v44, %v1366_v53  ;;  %v535_v47 = vpop.f32.mrb[39].mxu1 }
 0x1e3   :  { %v536_v49 = vadd.f32 %v1366_v53, %v535_v47 }
 0x1e4   :  { %v590_v50 = vpack.c.bf16 %v544_v46, %v541_v45 }
 0x1e5   :  { %v589_v51 = vpack.c.bf16 %v536_v49, %v533_v48 }
 0x1e7   :  { %v1040_v0 = vpop.f32.mrb[40].mxu1  ;;  %1082 = vmatprep.mubr.bf16.mxu0 %v589_v51 }
 0x1e8   :  { %v548_v38 = vpop.f32.mrb[41].mxu1  ;;  %1083 = vmatmul.mubr.bf16.gmra.mrb[36].mxu0 %v590_v50  ;;  %v557_v52 = vadd.f32 %v1040_v0, %v1366_v53 }
 0x1e9   :  { %v1041_v35 = vpop.f32.mrb[42].mxu1  ;;  %v549_v56 = vadd.f32 %v1366_v53, %v548_v38 }
 0x1ea   :  { %v560_v54 = vadd.f32 %v1041_v35, %v1366_v53  ;;  %v551_v55 = vpop.f32.mrb[43].mxu1 }
 0x1eb   :  { %v552_v57 = vadd.f32 %v1366_v53, %v551_v55 }
 0x1ec   :  { %v592_v58 = vpack.c.bf16 %v560_v54, %v557_v52 }
 0x1ed   :  { %v591_v59 = vpack.c.bf16 %v552_v57, %v549_v56 }
 0x1ef   :  { %v1044_v60 = vpop.f32.mrb[44].mxu1  ;;  %1086 = vmatprep.mubr.bf16.mxu0 %v591_v59 }
 0x1f0   :  { %v564_v61 = vpop.f32.mrb[45].mxu1  ;;  %1087 = vmatmul.mubr.bf16.gmra.mrb[40].mxu0 %v592_v58  ;;  %v573_v63 = vadd.f32 %v1044_v60, %v1366_v53 }
 0x1f1   :  { %v1045_v62 = vpop.f32.mrb[46].mxu1  ;;  %v565_v3 = vadd.f32 %v1366_v53, %v564_v61 }
 0x1f2   :  { %v576_v1 = vadd.f32 %v1045_v62, %v1366_v53  ;;  %v567_v2 = vpop.f32.mrb[47].mxu1 }
 0x1f3   :  { %v568_v4 = vadd.f32 %v1366_v53, %v567_v2 }
 0x1f4   :  { %v594_v5 = vpack.c.bf16 %v576_v1, %v573_v63 }
 0x1f5   :  { %v593_v6 = vpack.c.bf16 %v568_v4, %v565_v3 }
 0x1f7   :  { %1090 = vmatprep.mubr.bf16.mxu0 %v593_v6 }
 0x1f8   :  { %1091 = vmatmul.mubr.bf16.gmra.mrb[44].mxu0 %v594_v5 }
 0x293   :  { %v1064_v8 = vpop.f32.mrb[16].mxu0 }
 0x294   :  { %v709_v9 = vadd.f32 %v1064_v8, %v1400_v7  ;;  %v700_v10 = vpop.f32.mrb[17].mxu0 }
 0x295   :  { %v701_v11 = vadd.f32 %v1400_v7, %v700_v10  ;;  %v1065_v12 = vpop.f32.mrb[18].mxu0 }
 0x296   :  { %830 = vst.msk [vmem:[%s1569_s7 + $0x10] sm:$0xff] %vm827_vm2, %v709_v9  ;;  %v712_v53 = vadd.f32 %v1065_v12, %v1400_v7  ;;  %v703_v13 = vpop.f32.mrb[19].mxu0 }
 0x297   :  { %828 = vst.msk [vmem:[%s1569_s7] sm:$0xff] %vm827_vm2, %v701_v11  ;;  %v704_v14 = vadd.f32 %v1400_v7, %v703_v13 }
 0x298   :  { %831 = vst.msk [vmem:[%s1569_s7 + $0x18] sm:$0xff] %vm827_vm2, %v712_v53 }
 0x299   :  { %829 = vst.msk [vmem:[%s1569_s7 + $0x8] sm:$0xff] %vm827_vm2, %v704_v14 }
 0x29b   :  { %v1068_v15 = vpop.f32.mrb[20].mxu0 }
 0x29c   :  { %v725_v16 = vadd.f32 %v1068_v15, %v1400_v7  ;;  %v716_v17 = vpop.f32.mrb[21].mxu0 }
 0x29d   :  { %v717_v18 = vadd.f32 %v1400_v7, %v716_v17  ;;  %v1069_v19 = vpop.f32.mrb[22].mxu0 }
 0x29e   :  { %834 = vst.msk [vmem:[%s1569_s7 + $0x30] sm:$0xff] %vm827_vm2, %v725_v16  ;;  %v728_v20 = vadd.f32 %v1069_v19, %v1400_v7  ;;  %v719_v21 = vpop.f32.mrb[23].mxu0 }
 0x29f   :  { %832 = vst.msk [vmem:[%s1569_s7 + $0x20] sm:$0xff] %vm827_vm2, %v717_v18  ;;  %v720_v22 = vadd.f32 %v1400_v7, %v719_v21 }
 0x2a0   :  { %835 = vst.msk [vmem:[%s1569_s7 + $0x38] sm:$0xff] %vm827_vm2, %v728_v20 }
 0x2a1   :  { %833 = vst.msk [vmem:[%s1569_s7 + $0x28] sm:$0xff] %vm827_vm2, %v720_v22 }
 0x2a3   :  { %v1072_v23 = vpop.f32.mrb[24].mxu0 }
 0x2a4   :  { %v741_v24 = vadd.f32 %v1072_v23, %v1400_v7  ;;  %v732_v25 = vpop.f32.mrb[25].mxu0 }
 0x2a5   :  { %v733_v26 = vadd.f32 %v1400_v7, %v732_v25  ;;  %v1073_v27 = vpop.f32.mrb[26].mxu0 }
 0x2a6   :  { %838 = vst.msk [vmem:[%s1569_s7 + $0x50] sm:$0xff] %vm827_vm2, %v741_v24  ;;  %v744_v28 = vadd.f32 %v1073_v27, %v1400_v7  ;;  %v735_v29 = vpop.f32.mrb[27].mxu0 }
 0x2a7   :  { %836 = vst.msk [vmem:[%s1569_s7 + $0x40] sm:$0xff] %vm827_vm2, %v733_v26  ;;  %v736_v30 = vadd.f32 %v1400_v7, %v735_v29 }
 0x2a8   :  { %839 = vst.msk [vmem:[%s1569_s7 + $0x58] sm:$0xff] %vm827_vm2, %v744_v28 }
 0x2a9   :  { %837 = vst.msk [vmem:[%s1569_s7 + $0x48] sm:$0xff] %vm827_vm2, %v736_v30 }
 0x2ab   :  { %v1076_v31 = vpop.f32.mrb[28].mxu0 }
 0x2ac   :  { %v757_v32 = vadd.f32 %v1076_v31, %v1400_v7  ;;  %v748_v33 = vpop.f32.mrb[29].mxu0 }
 0x2ad   :  { %v749_v34 = vadd.f32 %v1400_v7, %v748_v33  ;;  %v1077_v36 = vpop.f32.mrb[30].mxu0 }
 0x2ae   :  { %842 = vst.msk [vmem:[%s1569_s7 + $0x70] sm:$0xff] %vm827_vm2, %v757_v32  ;;  %v760_v37 = vadd.f32 %v1077_v36, %v1400_v7  ;;  %v751_v39 = vpop.f32.mrb[31].mxu0 }
 0x2af   :  { %840 = vst.msk [vmem:[%s1569_s7 + $0x60] sm:$0xff] %vm827_vm2, %v749_v34  ;;  %v752_v40 = vadd.f32 %v1400_v7, %v751_v39 }
 0x2b0   :  { %843 = vst.msk [vmem:[%s1569_s7 + $0x78] sm:$0xff] %vm827_vm2, %v760_v37 }
 0x2b1   :  { %841 = vst.msk [vmem:[%s1569_s7 + $0x68] sm:$0xff] %vm827_vm2, %v752_v40 }
 0x2b3   :  { %v1080_v41 = vpop.f32.mrb[32].mxu0 }
 0x2b4   :  { %v773_v42 = vadd.f32 %v1080_v41, %v1400_v7  ;;  %v764_v43 = vpop.f32.mrb[33].mxu0 }
 0x2b5   :  { %v765_v44 = vadd.f32 %v1400_v7, %v764_v43  ;;  %v1081_v45 = vpop.f32.mrb[34].mxu0 }
 0x2b6   :  { %846 = vst.msk [vmem:[%s1569_s7 + $0x90] sm:$0xff] %vm827_vm2, %v773_v42  ;;  %v776_v46 = vadd.f32 %v1081_v45, %v1400_v7  ;;  %v767_v47 = vpop.f32.mrb[35].mxu0 }
 0x2b7   :  { %844 = vst.msk [vmem:[%s1569_s7 + $0x80] sm:$0xff] %vm827_vm2, %v765_v44  ;;  %v768_v48 = vadd.f32 %v1400_v7, %v767_v47 }
 0x2b8   :  { %847 = vst.msk [vmem:[%s1569_s7 + $0x98] sm:$0xff] %vm827_vm2, %v776_v46 }
 0x2b9   :  { %845 = vst.msk [vmem:[%s1569_s7 + $0x88] sm:$0xff] %vm827_vm2, %v768_v48 }
 0x2bb   :  { %v1084_v49 = vpop.f32.mrb[36].mxu0 }
 0x2bc   :  { %v789_v50 = vadd.f32 %v1084_v49, %v1400_v7  ;;  %v780_v51 = vpop.f32.mrb[37].mxu0 }
 0x2bd   :  { %v781_v0 = vadd.f32 %v1400_v7, %v780_v51  ;;  %v1085_v38 = vpop.f32.mrb[38].mxu0 }
 0x2be   :  { %850 = vst.msk [vmem:[%s1569_s7 + $0xb0] sm:$0xff] %vm827_vm2, %v789_v50  ;;  %v792_v35 = vadd.f32 %v1085_v38, %v1400_v7  ;;  %v783_v52 = vpop.f32.mrb[39].mxu0 }
 0x2bf   :  { %848 = vst.msk [vmem:[%s1569_s7 + $0xa0] sm:$0xff] %vm827_vm2, %v781_v0  ;;  %v784_v54 = vadd.f32 %v1400_v7, %v783_v52 }
 0x2c0   :  { %851 = vst.msk [vmem:[%s1569_s7 + $0xb8] sm:$0xff] %vm827_vm2, %v792_v35 }
 0x2c1   :  { %849 = vst.msk [vmem:[%s1569_s7 + $0xa8] sm:$0xff] %vm827_vm2, %v784_v54 }
 0x2c3   :  { %v1088_v55 = vpop.f32.mrb[40].mxu0 }
 0x2c4   :  { %v805_v56 = vadd.f32 %v1088_v55, %v1400_v7  ;;  %v796_v57 = vpop.f32.mrb[41].mxu0 }
 0x2c5   :  { %v797_v58 = vadd.f32 %v1400_v7, %v796_v57  ;;  %v1089_v59 = vpop.f32.mrb[42].mxu0 }
 0x2c6   :  { %854 = vst.msk [vmem:[%s1569_s7 + $0xd0] sm:$0xff] %vm827_vm2, %v805_v56  ;;  %v808_v60 = vadd.f32 %v1089_v59, %v1400_v7  ;;  %v799_v61 = vpop.f32.mrb[43].mxu0 }
 0x2c7   :  { %852 = vst.msk [vmem:[%s1569_s7 + $0xc0] sm:$0xff] %vm827_vm2, %v797_v58  ;;  %v800_v62 = vadd.f32 %v1400_v7, %v799_v61 }
 0x2c8   :  { %855 = vst.msk [vmem:[%s1569_s7 + $0xd8] sm:$0xff] %vm827_vm2, %v808_v60 }
 0x2c9   :  { %853 = vst.msk [vmem:[%s1569_s7 + $0xc8] sm:$0xff] %vm827_vm2, %v800_v62 }
 0x2cb   :  { %v1092_v63 = vpop.f32.mrb[44].mxu0 }
 0x2cc   :  { %v821_v1 = vadd.f32 %v1092_v63, %v1400_v7  ;;  %v812_v2 = vpop.f32.mrb[45].mxu0 }
 0x2cd   :  { %v813_v3 = vadd.f32 %v1400_v7, %v812_v2  ;;  %v1093_v4 = vpop.f32.mrb[46].mxu0 }
 0x2ce   :  { %858 = vst.msk [vmem:[%s1569_s7 + $0xf0] sm:$0xff] %vm827_vm2, %v821_v1  ;;  %v824_v5 = vadd.f32 %v1093_v4, %v1400_v7  ;;  %v815_v6 = vpop.f32.mrb[47].mxu0 }
 0x2cf   :  { %856 = vst.msk [vmem:[%s1569_s7 + $0xe0] sm:$0xff] %vm827_vm2, %v813_v3  ;;  %v816_v8 = vadd.f32 %v1400_v7, %v815_v6 }
 0x2d0   :  { %859 = vst.msk [vmem:[%s1569_s7 + $0xf8] sm:$0xff] %vm827_vm2, %v824_v5 }
 0x2d1   :  { %857 = vst.msk [vmem:[%s1569_s7 + $0xe8] sm:$0xff] %vm827_vm2, %v816_v8 }

</bundles_post_ra>
